<compile_context>
chip_gen: v5e
topology: v5e:2x2
jax: 0.10.0
libtpu: 0.0.40
codegen_flags: <defaults>
</compile_context>

<pallas_src>
import jax
import jax.numpy as jnp
import numpy as np
from jax.experimental import pallas as pl
from jax.experimental.pallas import tpu as pltpu


# ----------------------------------------------------------------------------
# Kernels
# ----------------------------------------------------------------------------
def _attn_kernel(e1_ref, e2_ref, w_ref, out_ref):
    # e1_ref/e2_ref: (TB, S, D) native dtype, w_ref: (1, D) f32, out_ref: (TB, S)
    diff = e1_ref[...].astype(jnp.float32) - e2_ref[...].astype(jnp.float32)
    logits = jnp.sum(diff * w_ref[...], axis=-1)            # VPU mul + lane reduce -> (TB, S)
    m = jnp.max(logits, axis=-1, keepdims=True)             # softmax over S (lane axis)
    ex = jnp.exp(logits - m)
    out_ref[...] = (ex / jnp.sum(ex, axis=-1, keepdims=True)).astype(out_ref.dtype)


def _attn_kernel_masked(e1_ref, e2_ref, w_ref, mask_ref, out_ref):
    # mask_ref: (TB, S) int8 (nonzero = masked -> -inf), applied in-kernel.
    diff = e1_ref[...].astype(jnp.float32) - e2_ref[...].astype(jnp.float32)
    logits = jnp.sum(diff * w_ref[...], axis=-1)
    logits = jnp.where(mask_ref[...] != 0, -jnp.inf, logits)
    m = jnp.max(logits, axis=-1, keepdims=True)
    ex = jnp.exp(logits - m)
    out_ref[...] = (ex / jnp.sum(ex, axis=-1, keepdims=True)).astype(out_ref.dtype)


# ----------------------------------------------------------------------------
# Tile / VMEM sizing
# ----------------------------------------------------------------------------
def _round_up(x, m):
    return ((x + m - 1) // m) * m


def _vmem_caps():
    cap = 64 * 1024 * 1024                      # conservative fallback = v7x physical VMEM
    try:
        cap = int(pltpu.get_tpu_info().vmem_capacity_bytes)
    except Exception:                           # interpret mode / older jax
        pass
    tile_budget = int(0.55 * cap)               # headroom for pipeline slack
    vmem_limit = int(0.70 * cap)                # ~90 MiB on v5e/v6e, ~45 MiB on v7x
    return tile_budget, vmem_limit


def _pick_batch_tile(B, S, D, e_itemsize, has_mask, budget_bytes):
    """Batch tile sized from the REAL (sublane, lane)-padded VMEM footprint,
    capped so the grid has >= 4 steps (megacore sharding + DMA pipelining)."""
    d_lanes = _round_up(D, 128)
    s_sub_e = _round_up(S, 8 * max(1, 4 // e_itemsize))   # 8 rows f32, 16 rows bf16
    s_lanes = _round_up(S, 128)

    per_b = 2 * 2 * s_sub_e * d_lanes * e_itemsize        # e1 + e2, double buffered
    per_b += 2 * s_lanes * 4                               # f32-ish output, double buffered
    if has_mask:
        per_b += 2 * s_lanes * 1                           # int8 mask, double buffered
    fixed = 2 * 8 * d_lanes * 4                            # (1, D) weight block

    tb = max(1, (budget_bytes - fixed) // max(per_b, 1))
    # Keep >= 4 grid steps so v7x's two TensorCores both get work and the
    # next block's DMA can overlap compute on every generation.
    tb = min(tb, _round_up(pl.cdiv(B, 4), 32))
    if tb >= B:
        return B
    tb = (tb // 32) * 32         # mask(int8)/output(f32) sublane-packing friendly
    if tb < 32:
        return B
    return tb


# ----------------------------------------------------------------------------
# Wrapper
# ----------------------------------------------------------------------------
def attention_weights(energy1, energy2, weight, bias=None, mask=None, batch_tile=None):
    """energy1/energy2: (B, S, D), any float dtype (kept native -- no wrapper cast);
    weight: (1, D) or (D,) (nn.Linear layout, output_dim == 1);
    bias: (1,) -- unused (cancels exactly under the softmax);
    mask: (B, S) bool/int or None (True/nonzero = masked with -inf).
    Returns (B, S) attention weights in energy1.dtype, softmax along S (dim=1)."""
    B, S, D = energy1.shape
    assert energy2.shape == (B, S, D)
    del bias   # alpha(e1) + 1 - alpha(e2): bias cancels; the "+1" drops under softmax

    w = jnp.asarray(weight, jnp.float32)
    if w.ndim == 2:
        assert w.shape == (1, D), "squeeze(-1) in the module implies output_dim == 1"
        w2d = w
    else:
        assert w.shape == (D,)
        w2d = w.reshape(1, D)

    has_mask = mask is not None
    e_itemsize = jnp.dtype(energy1.dtype).itemsize
    tile_budget, vmem_limit = _vmem_caps()

    TB = batch_tile if batch_tile is not None else _pick_batch_tile(
        B, S, D, e_itemsize, has_mask, tile_budget)
    TB = min(int(TB), B)
    if TB < B:
        mult = 32 if has_mask else 8           # sublane-packing for 2-D out/mask blocks
        TB = (TB // mult) * mult
        if TB < mult:
            TB = B
    grid = (pl.cdiv(B, TB),)                   # ragged last block is fine (writes masked)

    e_spec = pl.BlockSpec((TB, S, D), lambda b: (b, 0, 0))
    w_spec = pl.BlockSpec((1, D), lambda b: (0, 0))
    out_spec = pl.BlockSpec((TB, S), lambda b: (b, 0))
    out_shape = jax.ShapeDtypeStruct((B, S), energy1.dtype)

    cparams = pltpu.CompilerParams(
        dimension_semantics=("parallel",),      # batch blocks are independent (megacore)
        vmem_limit_bytes=vmem_limit,
    )

    if not has_mask:
        return pl.pallas_call(
            _attn_kernel,
            out_shape=out_shape,
            grid=grid,
            in_specs=[e_spec, e_spec, w_spec],
            out_specs=out_spec,
            compiler_params=cparams,
        )(energy1, energy2, w2d)

    mask_i8 = jnp.asarray(mask).astype(jnp.int8)   # 1 byte/elem, negligible vs energies
    m_spec = pl.BlockSpec((TB, S), lambda b: (b, 0))
    return pl.pallas_call(
        _attn_kernel_masked,
        out_shape=out_shape,
        grid=grid,
        in_specs=[e_spec, e_spec, w_spec, m_spec],
        out_specs=out_spec,
        compiler_params=cparams,
    )(energy1, energy2, w2d, mask_i8)


# ----------------------------------------------------------------------------
# Pure-JAX reference (mirrors the PyTorch module exactly, bias included)
# ----------------------------------------------------------------------------
def _reference(energy1, energy2, weight, bias, mask=None):
    e1 = energy1.astype(jnp.float32)
    e2 = energy2.astype(jnp.float32)
    w = weight.astype(jnp.float32)
    b = bias.astype(jnp.float32)
    a1 = e1 @ w.T + b
    a2 = e2 @ w.T + b
    logits = (a1 + (1.0 - a2))[..., 0]
    if mask is not None:
        logits = jnp.where(mask, -jnp.inf, logits)
    return jax.nn.softmax(logits, axis=1)


if __name__ == "__main__":
    B, S, D_in, D_out = 2, 8, 32, 1   # output_dim = 1 so squeeze(-1) drops it

    key = jax.random.PRNGKey(0)
    k1, k2, kw, kb, k3, k4, kl = jax.random.split(key, 7)

    energy1 = jax.random.normal(k1, (B, S, D_in), dtype=jnp.float32)
    energy2 = jax.random.normal(k2, (B, S, D_in), dtype=jnp.float32)

    # Deterministic nn.Linear-style init: U(-1/sqrt(D_in), 1/sqrt(D_in))
    bound = 1.0 / np.sqrt(D_in)
    weight = jax.random.uniform(kw, (D_out, D_in), jnp.float32, -bound, bound)
    bias = jax.random.uniform(kb, (D_out,), jnp.float32, -bound, bound)

    # --- 1) f32, unmasked ---
    out = jax.block_until_ready(attention_weights(energy1, energy2, weight, bias))
    ref = _reference(energy1, energy2, weight, bias)
    np.testing.assert_allclose(np.asarray(out), np.asarray(ref), rtol=1e-5, atol=1e-6)

    # --- 2) f32, masked (no fully-masked rows) ---
    lengths = jnp.array([S, S - 3], dtype=jnp.int32)
    mask = jnp.arange(S)[None, :] >= lengths[:, None]        # (B, S) bool
    out_m = jax.block_until_ready(attention_weights(energy1, energy2, weight, bias, mask=mask))
    ref_m = _reference(energy1, energy2, weight, bias, mask=mask)
    np.testing.assert_allclose(np.asarray(out_m), np.asarray(ref_m), rtol=1e-5, atol=1e-6)

    # --- 3) f32, unmasked, forced batch tiling with ragged last block (cdiv path) ---
    B3 = 20
    e1_3 = jax.random.normal(k3, (B3, S, D_in), dtype=jnp.float32)
    e2_3 = jax.random.normal(k4, (B3, S, D_in), dtype=jnp.float32)
    out3 = jax.block_until_ready(
        attention_weights(e1_3, e2_3, weight, bias, batch_tile=8))   # grid = cdiv(20, 8) = 3
    ref3 = _reference(e1_3, e2_3, weight, bias)
    np.testing.assert_allclose(np.asarray(out3), np.asarray(ref3), rtol=1e-5, atol=1e-6)

    # --- 4) bf16 energies (native-dtype path), masked, tiled + ragged last block ---
    B4 = 40
    e1_4 = jax.random.normal(k3, (B4, S, D_in), dtype=jnp.float32).astype(jnp.bfloat16)
    e2_4 = jax.random.normal(k4, (B4, S, D_in), dtype=jnp.float32).astype(jnp.bfloat16)
    lens4 = 1 + jax.random.randint(kl, (B4,), 0, S)                  # >= 1 valid per row
    mask4 = jnp.arange(S)[None, :] >= lens4[:, None]
    out4 = jax.block_until_ready(
        attention_weights(e1_4, e2_4, weight, bias, mask=mask4, batch_tile=32))  # grid = 2
    ref4 = _reference(e1_4, e2_4, weight, bias, mask=mask4)
    np.testing.assert_allclose(np.asarray(out4, dtype=np.float32), np.asarray(ref4),
                               rtol=2e-2, atol=5e-3)

    print("KERNEL_OK")
</pallas_src>

<mosaic_0001>
module attributes {stable_mosaic.version = 11 : i64} {
  func.func @_attn_kernel(%arg0: i32, %arg1: memref<2x8x32xf32, #tpu.memory_space<vmem>>, %arg2: memref<2x8x32xf32, #tpu.memory_space<vmem>>, %arg3: memref<1x32xf32, #tpu.memory_space<vmem>>, %arg4: memref<2x8xf32, #tpu.memory_space<vmem>>) attributes {dimension_semantics = [#tpu.dimension_semantics<parallel>], iteration_bounds = array<i64: 1>, scalar_prefetch = 0 : i64, scratch_operands = 0 : i64, tpu.core_type = #tpu.core_type<tc>, window_params = [{transform_indices = @transform_0, window_bounds = array<i64: 2, 8, 32>}, {transform_indices = @transform_1, window_bounds = array<i64: 2, 8, 32>}, {pipeline_mode = #tpu.pipeline_mode<synchronous>, transform_indices = @transform_2, window_bounds = array<i64: 1, 32>}, {transform_indices = @transform_3, window_bounds = array<i64: 2, 8>}]} {
    %c0 = arith.constant 0 : index
    %c0_0 = arith.constant 0 : index
    %c0_1 = arith.constant 0 : index
    %0 = vector.load %arg1[%c0, %c0_0, %c0_1] : memref<2x8x32xf32, #tpu.memory_space<vmem>>, vector<2x8x32xf32>
    %c0_2 = arith.constant 0 : index
    %c0_3 = arith.constant 0 : index
    %c0_4 = arith.constant 0 : index
    %1 = vector.load %arg2[%c0_2, %c0_3, %c0_4] : memref<2x8x32xf32, #tpu.memory_space<vmem>>, vector<2x8x32xf32>
    %2 = arith.subf %0, %1 : vector<2x8x32xf32>
    %c0_5 = arith.constant 0 : index
    %c0_6 = arith.constant 0 : index
    %3 = vector.load %arg3[%c0_5, %c0_6] : memref<1x32xf32, #tpu.memory_space<vmem>>, vector<1x32xf32>
    %4 = vector.shape_cast %3 : vector<1x32xf32> to vector<1x1x32xf32>
    %5 = vector.broadcast %4 : vector<1x1x32xf32> to vector<2x8x32xf32>
    %6 = arith.mulf %2, %5 : vector<2x8x32xf32>
    %cst = arith.constant dense<0.000000e+00> : vector<2x8xf32>
    %7 = vector.multi_reduction <add>, %6, %cst [2] : vector<2x8x32xf32> to vector<2x8xf32>
    %cst_7 = arith.constant dense<0xFF800000> : vector<2xf32>
    %8 = vector.multi_reduction <maximumf>, %7, %cst_7 [1] : vector<2x8xf32> to vector<2xf32>
    %9 = vector.shape_cast %8 : vector<2xf32> to vector<2x1xf32>
    %10 = vector.broadcast %9 : vector<2x1xf32> to vector<2x8xf32>
    %11 = arith.subf %7, %10 : vector<2x8xf32>
    %12 = math.exp %11 : vector<2x8xf32>
    %cst_8 = arith.constant dense<0.000000e+00> : vector<2xf32>
    %13 = vector.multi_reduction <add>, %12, %cst_8 [1] : vector<2x8xf32> to vector<2xf32>
    %14 = vector.shape_cast %13 : vector<2xf32> to vector<2x1xf32>
    %15 = vector.broadcast %14 : vector<2x1xf32> to vector<2x8xf32>
    %16 = arith.divf %12, %15 : vector<2x8xf32>
    %c0_9 = arith.constant 0 : index
    %c0_10 = arith.constant 0 : index
    %17 = vector.load %arg4[%c0_9, %c0_10] : memref<2x8xf32, #tpu.memory_space<vmem>>, vector<2x8xf32>
    tpu.vector_store %arg4[%c0_9, %c0_10], %16 {strides = array<i32>} : memref<2x8xf32, #tpu.memory_space<vmem>>, vector<2x8xf32>,
    return
  }
  func.func @transform_0(%arg0: i32) -> (i32, i32, i32) {
    %c0_i32 = arith.constant 0 : i32
    %c0_i32_0 = arith.constant 0 : i32
    %c0_i32_1 = arith.constant 0 : i32
    return %arg0, %c0_i32, %c0_i32_0 : i32, i32, i32
  }
  func.func @transform_1(%arg0: i32) -> (i32, i32, i32) {
    %c0_i32 = arith.constant 0 : i32
    %c0_i32_0 = arith.constant 0 : i32
    %c0_i32_1 = arith.constant 0 : i32
    return %arg0, %c0_i32, %c0_i32_0 : i32, i32, i32
  }
  func.func @transform_2(%arg0: i32) -> (i32, i32) {
    %c0_i32 = arith.constant 0 : i32
    %c0_i32_0 = arith.constant 0 : i32
    %c0_i32_1 = arith.constant 0 : i32
    return %c0_i32, %c0_i32_0 : i32, i32
  }
  func.func @transform_3(%arg0: i32) -> (i32, i32) {
    %c0_i32 = arith.constant 0 : i32
    %c0_i32_0 = arith.constant 0 : i32
    return %arg0, %c0_i32 : i32, i32
  }
}

</mosaic_0001>

<bundles_post_ra>
// kernel: tpu_custom_call.1
= control target key start
LH: loop header
LB: loop body
LE: loop exit
PB: predicated region body
PF: predicated region fallthrough
CT: control target
= control target key end

     0   :  { %8 = vsyncpa [#allocation3], 0  ;;  %s319_s0 = inlined_call_operand.hbm [shape: f32[2,8,32], index: 0, kind: input, shape index: {}]   ;;  %s320_s1 = inlined_call_operand.hbm [shape: f32[2,8,32], index: 1, kind: input, shape index: {}]   ;;  %s321_s2 = inlined_call_operand.vmem [shape: f32[1,32], index: 2, kind: input, shape index: {}]   ;;  %s322_s3 = inlined_call_operand.hbm [shape: f32[2,8], index: 3, kind: output, shape index: {}]  }
   0x1   :  { %9 = vsyncpa [#allocation6], 0 }
   0x2   :  { %10 = vsyncpa [#allocation4], 0  ;;  %s15_s14 = sshll.u32 %s319_s0, 4  ;;  %s267_s15 = smov [#allocation2]   ;;  %s16_s14 = int_to_ptr.hbm [resolvable:$true] %s15_s14 }
   0x3   :  { %s17_s16 = sshll.u32 %s267_s15, 4  ;;  %s28_s19 = sshll.u32 %s320_s1, 4  ;;  %s18_s16 = int_to_ptr.vmem [resolvable:$true] %s17_s16  ;;  %s29_s19 = int_to_ptr.hbm [resolvable:$true] %s28_s19 }
   0x4   :  { %s268_s20 = smov 128   ;;  %s269_s21 = smov 8  }
   0x5   :  { %23 = dma.hbm_to_vmem [thread:$0]  %s16_s14, 256, %s18_s16, [#allocation3], %s268_s20, %s268_s20, %s269_s21  }
   0x6   :  { %s270_s22 = smov [#allocation5]  }
   0x7   :  { %s30_s23 = sshll.u32 %s270_s22, 4  ;;  %s31_s23 = int_to_ptr.vmem [resolvable:$true] %s30_s23 }
   0x8   :  { %36 = dma.hbm_to_vmem [thread:$0]  %s29_s19, 256, %s31_s23, [#allocation6], %s268_s20, %s268_s20, %s269_s21  }
   0x9   :  { %261 = dma.done.wait [#allocation3], 256  }
   0xa   :  { %262 = vsyncadd [#allocation3], 4294967040 }
   0xb   :  { %263 = dma.done.wait [#allocation6], 256  }
   0xc   :  { %264 = vsyncadd [#allocation6], 4294967040  ;;  %v47_v0 = vld [vmem:[#allocation2] sm:$0xff]  ;;  %v49_v1 = vld [vmem:[#allocation5] sm:$0xff]  ;;  %vm59_vm0 = vcmask 261120   ;;  %v68_v12 = vlaneseq  ;;  %vm72_vm1 = vcmask 1041409  }
   0xd   :  { %v51_v2 = vsub.f32 %v47_v0, %v49_v1  ;;  %v180_v3 = vld [vmem:[%s321_s2] ss:$0 sm:$0xff]  ;;  %v48_v4 = vld [vmem:[#allocation2 + $0x8] sm:$0xff]  ;;  %v50_v5 = vld [vmem:[#allocation5 + $0x8] sm:$0xff]  ;;  %vm75_vm2 = vcmask 58368   ;;  %v271_v19 = vmov 0  }
   0xe   :  { %v52_v7 = vsub.f32 %v48_v4, %v50_v5  ;;  %v302_v13 = vand.u32 127, %v68_v12  ;;  %178 = vset.pattern.permute.xlu2 %v271_v19  ;;  %177 = vset.pattern.permute.xlu1 %v271_v19  ;;  %s272_s1 = smov [#allocation7]   ;;  %s160_s27 = sshll.u32 %s322_s3, 4  ;;  %s161_s27 = int_to_ptr.hbm [resolvable:$true] %s160_s27 }
   0xf   :  { %v57_v6 = vmul.f32 %v180_v3, %v51_v2  ;;  %179 = vset.pattern.permute.xlu0 %v271_v19  ;;  %s158_s2 = sshll.u32 %s272_s1, 4  ;;  %s159_s2 = int_to_ptr.vmem [resolvable:$true] %s158_s2 }
  0x10   :  { %v58_v9 = vmul.f32 %v180_v3, %v52_v7 }
  0x11   :  { %v60_v8 = vsel %vm59_vm0, %v57_v6, 0.0 }
  0x12   :  { %61 = vadd.xlane.f32.xlu0 %v60_v8  ;;  %v63_v10 = vsel %vm59_vm0, %v58_v9, 0.0 }
  0x1a   :  { %64 = vadd.xlane.f32.xlu0 %v63_v10 }
  0x85   :  { %v62_v11 = vpop.xlane.xlu0 %61 }
  0x86   :  { %v70_v15 = vperm.slane %v62_v11, %v302_v13 }
  0x8d   :  { %v65_v14 = vpop.xlane.xlu0 %64 }
  0x8e   :  { %v71_v16 = vperm.slane %v65_v14, %v302_v13 }
  0x90   :  { %v73_v17 = vsel %vm72_vm1, %v71_v16, %v70_v15 }
  0x91   :  { %v76_v18 = vsel %vm75_vm2, %v73_v17, -inf }
  0x92   :  { %77 = vmax.xlane.f32.xlu1 %v76_v18 }
 0x105   :  { %v78_v20 = vpop.xlane.xlu1 %77 }
 0x106   :  { %v80_v21 = vperm.slane %v78_v20, 0  ;;  %v81_v22 = vperm.slane %v78_v20, 1 }
 0x108   :  { %v84_v23 = vsub.f32 %v62_v11, %v80_v21  ;;  %v85_v24 = vsub.f32 %v65_v14, %v81_v22 }
 0x10a   :  { %v86_v25 = vmul.f32 1.442695, %v84_v23  ;;  %v88_v26 = vmul.f32 1.442695, %v85_v24 }
 0x10c   :  { %181 = vpow2.f32 %v86_v25 }
 0x10d   :  { %183 = vpow2.f32 %v88_v26 }
 0x112   :  { %v182_v27 = vpop.eup %181 }
 0x113   :  { %v184_v28 = vpop.eup %183  ;;  %93 = vperm.xlu1 %177, %v182_v27  }
 0x114   :  { %96 = vperm.xlu2 %178, %v184_v28  }
 0x16e   :  { %v97_v29 = vpop.permute.xlu2 %96 }
 0x16f   :  { %v99_v31 = vperm.slane %v97_v29, %v302_v13 }
 0x185   :  { %v94_v30 = vpop.permute.xlu1 %93 }
 0x186   :  { %v98_v32 = vperm.slane %v94_v30, %v302_v13 }
 0x188   :  { %v100_v33 = vsel %vm72_vm1, %v99_v31, %v98_v32 }
 0x189   :  { %v102_v34 = vsel %vm75_vm2, %v100_v33, 0.0 }
 0x18a   :  { %103 = vadd.xlane.f32.xlu2 %v102_v34 }
 0x1fd   :  { %v104_v35 = vpop.xlane.xlu2 %103 }
 0x1fe   :  { %v106_v36 = vperm.slane %v104_v35, 0  ;;  %v107_v37 = vperm.slane %v104_v35, 1 }
 0x200   :  { %185 = vrcp.f32 %v106_v36  ;;  %v121_v44 = vand.u32 2147483648, %v106_v36  ;;  %v136_v45 = vand.u32 2147483648, %v107_v37  ;;  %v119_v47 = vand.u32 2147483647, %v106_v36 }
 0x201   :  { %187 = vrcp.f32 %v107_v37  ;;  %v134_v49 = vand.u32 2147483647, %v107_v37  ;;  %vm115_vm5 = vweird.f32 %v106_v36  ;;  %vm130_vm6 = vweird.f32 %v107_v37 }
 0x202   :  { %v122_v52 = vor.u32 1.1754944e-38, %v121_v44  ;;  %v137_v53 = vor.u32 1.1754944e-38, %v136_v45  ;;  %vm120_vm9 = vcmp.eq.f32.partialorder %v119_v47, 8.507059e+37 }
 0x203   :  { %vm135_vm10 = vcmp.eq.f32.partialorder %v134_v49, 8.507059e+37 }
 0x206   :  { %v186_v38 = vpop.eup %185 }
 0x207   :  { %v188_v39 = vpop.eup %187  ;;  %v111_v40 = vmul.f32 %v186_v38, %v106_v36  ;;  %vm116_vm3 = vweird.f32 %v186_v38 }
 0x208   :  { %v126_v41 = vmul.f32 %v188_v39, %v107_v37  ;;  %vm131_vm4 = vweird.f32 %v188_v39  ;;  %vm117_vm7 = vmor %vm115_vm5, %vm116_vm3 }
 0x209   :  { %v112_v42 = vsub.f32 1.0, %v111_v40  ;;  %vm132_vm8 = vmor %vm130_vm6, %vm131_vm4 }
 0x20a   :  { %v127_v43 = vsub.f32 1.0, %v126_v41 }
 0x20b   :  { %v113_v46 = vmul.f32 %v186_v38, %v112_v42 }
 0x20c   :  { %v128_v48 = vmul.f32 %v188_v39, %v127_v43 }
 0x20d   :  { %v114_v50 = vadd.f32 %v186_v38, %v113_v46 }
 0x20e   :  { %v129_v51 = vadd.f32 %v188_v39, %v128_v48 }
 0x20f   :  { %v118_v54 = vsel %vm117_vm7, %v186_v38, %v114_v50 }
 0x210   :  { %v133_v55 = vsel %vm132_vm8, %v188_v39, %v129_v51  ;;  %v123_v56 = vsel %vm120_vm9, %v122_v52, %v118_v54 }
 0x211   :  { %v138_v57 = vsel %vm135_vm10, %v137_v53, %v133_v55  ;;  %v124_v58 = vmul.f32 %v182_v27, %v123_v56 }
 0x212   :  { %v139_v59 = vmul.f32 %v184_v28, %v138_v57 }
 0x213   :  { %143 = vperm.xlu0 %179, %v124_v58  }
 0x214   :  { %146 = vperm.xlu1 %177, %v139_v59  }
 0x285   :  { %v144_v60 = vpop.permute.xlu0 %143 }
 0x286   :  { %v147_v61 = vpop.permute.xlu1 %146  ;;  %v148_v62 = vperm.slane %v144_v60, %v302_v13 }
 0x287   :  { %v149_v63 = vperm.slane %v147_v61, %v302_v13 }
 0x289   :  { %v150_v0 = vsel %vm72_vm1, %v149_v63, %v148_v62 }
 0x28a   :  { %152 = vst.msk [vmem:[#allocation7] sm:$0x3] %vm75_vm2, %v150_v0 }
 0x28b   :  { %163 = dma.vmem_to_hbm [thread:$0]  %s159_s2, 32, %s161_s27, [#allocation4]  }
 0x28c   :  { %265 = dma.done.wait [#allocation4], 32  }
 0x28d   :  { %266 = vsyncadd [#allocation4], 4294967264 }
 0x28e   :  { %168 = vsyncpa [#allocation3], 1 }
 0x28f   :  { %169 = vsyncpa [#allocation6], 1 }
 0x290   :  { %170 = vsyncpa [#allocation4], 1 }

</bundles_post_ra>
